<compile_context>
chip_gen: v7x
topology: tpu7x:2x2x1
jax: 0.10.0
libtpu: 0.0.40
codegen_flags: <defaults>
</compile_context>

<pallas_src>
import jax
import jax.numpy as jnp
from jax.experimental import pallas as pl
from jax.experimental.pallas import tpu as pltpu


def _encoder_to_latents_kernel(x_ref, w_ref, b_ref, out_ref):
    # x_ref:  (tm, K)   f32  — one batch tile
    # w_ref:  (K, 2L)   f32  — fused [W_mean | W_logvar], resident across grid
    # b_ref:  (1, 2L)   f32  — fused bias, resident across grid
    # out_ref:(tm, 2L)  f32  — lane-dense fused output [mu | logvar]
    y = jnp.dot(x_ref[...], w_ref[...], preferred_element_type=jnp.float32)
    out_ref[...] = (y + b_ref[...]).astype(out_ref.dtype)


def prepare_params(w_mean, b_mean, w_logvar, b_logvar):
    """One-time parameter prep (do this at param-load time, NOT per call).

    w_*: (L, 49) PyTorch layout; b_*: (L,).
    Returns fused, pre-transposed (49, 2L) weight and (1, 2L) bias.
    """
    w_fused = jnp.concatenate(
        [jnp.asarray(w_mean, jnp.float32), jnp.asarray(w_logvar, jnp.float32)],
        axis=0,
    ).T                                                        # (49, 2L)
    b_fused = jnp.concatenate(
        [jnp.asarray(b_mean, jnp.float32), jnp.asarray(b_logvar, jnp.float32)],
        axis=0,
    )[None, :]                                                 # (1, 2L)
    return w_fused, b_fused


def encoder_to_latents(x, w_fused, b_fused, *, block_rows=512):
    """x: (B, 49); w_fused: (49, 2L); b_fused: (1, 2L). Returns (mu, logvar)."""
    x = jnp.asarray(x, jnp.float32)
    B, K = x.shape
    twoL = w_fused.shape[1]
    L = twoL // 2

    # Batch tile: 512 rows per step when batch is large (good HBM-roofline
    # tile), otherwise take the whole (small) batch in one block.
    tm = block_rows if B >= block_rows else B
    grid = (pl.cdiv(B, tm),)

    cost = pl.CostEstimate(
        flops=2 * B * K * twoL,
        transcendentals=0,
        bytes_accessed=4 * (B * K + K * twoL + twoL + B * twoL),
    )

    out = pl.pallas_call(
        _encoder_to_latents_kernel,
        out_shape=jax.ShapeDtypeStruct((B, twoL), jnp.float32),
        grid=grid,
        in_specs=[
            pl.BlockSpec((tm, K), lambda i: (i, 0)),      # x: tiled over batch
            pl.BlockSpec((K, twoL), lambda i: (0, 0)),    # fused W: resident
            pl.BlockSpec((1, twoL), lambda i: (0, 0)),    # fused b: resident
        ],
        out_specs=pl.BlockSpec((tm, twoL), lambda i: (i, 0)),
        compiler_params=pltpu.CompilerParams(
            dimension_semantics=("parallel",),
        ),
        cost_estimate=cost,
    )(x, w_fused, b_fused)

    # Split the lane-dense fused output back into the two heads (cheap slice).
    return out[:, :L], out[:, L:]


def init_params(key, num_latents, in_features=49):
    """Deterministic init matching nn.Linear's shapes (PyTorch-style uniform)."""
    k1, k2, k3, k4 = jax.random.split(key, 4)
    bound = 1.0 / jnp.sqrt(in_features)
    w_mean = jax.random.uniform(k1, (num_latents, in_features), jnp.float32,
                                -bound, bound)
    b_mean = jax.random.uniform(k2, (num_latents,), jnp.float32, -bound, bound)
    w_logvar = jax.random.uniform(k3, (num_latents, in_features), jnp.float32,
                                  -bound, bound)
    b_logvar = jax.random.uniform(k4, (num_latents,), jnp.float32,
                                  -bound, bound)
    return w_mean, b_mean, w_logvar, b_logvar


if __name__ == "__main__":
    key = jax.random.PRNGKey(0)
    k_x, k_p = jax.random.split(key)

    B = 2               # batch
    num_latents = 32    # latent dim
    x = jax.random.normal(k_x, (B, 49), jnp.float32)

    w_mean, b_mean, w_logvar, b_logvar = init_params(k_p, num_latents)

    # One-time param prep (off the hot path).
    w_fused, b_fused = prepare_params(w_mean, b_mean, w_logvar, b_logvar)

    mu, logvar = encoder_to_latents(x, w_fused, b_fused)
    jax.block_until_ready((mu, logvar))

    # Correctness check vs. plain JAX reference of the PyTorch forward.
    mu_ref = x @ w_mean.T + b_mean
    lv_ref = x @ w_logvar.T + b_logvar
    assert mu.shape == (B, num_latents) and logvar.shape == (B, num_latents)
    assert jnp.allclose(mu, mu_ref, atol=1e-5)
    assert jnp.allclose(logvar, lv_ref, atol=1e-5)

    print("KERNEL_OK")
</pallas_src>

<mosaic_0001>
module attributes {stable_mosaic.version = 11 : i64} {
  func.func @_encoder_to_latents_kernel(%arg0: i32, %arg1: memref<2x49xf32, #tpu.memory_space<vmem>>, %arg2: memref<49x64xf32, #tpu.memory_space<vmem>>, %arg3: memref<1x64xf32, #tpu.memory_space<vmem>>, %arg4: memref<2x64xf32, #tpu.memory_space<vmem>>) attributes {dimension_semantics = [#tpu.dimension_semantics<parallel>], iteration_bounds = array<i64: 1>, scalar_prefetch = 0 : i64, scratch_operands = 0 : i64, tpu.core_type = #tpu.core_type<tc>, window_params = [{transform_indices = @transform_0, window_bounds = array<i64: 2, 49>}, {pipeline_mode = #tpu.pipeline_mode<synchronous>, transform_indices = @transform_1, window_bounds = array<i64: 49, 64>}, {pipeline_mode = #tpu.pipeline_mode<synchronous>, transform_indices = @transform_2, window_bounds = array<i64: 1, 64>}, {transform_indices = @transform_3, window_bounds = array<i64: 2, 64>}]} {
    %c0 = arith.constant 0 : index
    %c0_0 = arith.constant 0 : index
    %0 = vector.load %arg1[%c0, %c0_0] : memref<2x49xf32, #tpu.memory_space<vmem>>, vector<2x49xf32>
    %c0_1 = arith.constant 0 : index
    %c0_2 = arith.constant 0 : index
    %1 = vector.load %arg2[%c0_1, %c0_2] : memref<49x64xf32, #tpu.memory_space<vmem>>, vector<49x64xf32>
    %cst = arith.constant dense<0.000000e+00> : vector<2x64xf32>
    %2 = tpu.matmul %0, %1, %cst {dimension_numbers = #tpu.dot_dimension_numbers<[1], [0], [0], [1], [0, 0, 1, 1], [], []>} : vector<2x49xf32>, vector<49x64xf32>, vector<2x64xf32> -> vector<2x64xf32>
    %c0_3 = arith.constant 0 : index
    %c0_4 = arith.constant 0 : index
    %3 = vector.load %arg3[%c0_3, %c0_4] : memref<1x64xf32, #tpu.memory_space<vmem>>, vector<1x64xf32>
    %4 = vector.broadcast %3 : vector<1x64xf32> to vector<2x64xf32>
    %5 = arith.addf %2, %4 : vector<2x64xf32>
    %c0_5 = arith.constant 0 : index
    %c0_6 = arith.constant 0 : index
    %6 = vector.load %arg4[%c0_5, %c0_6] : memref<2x64xf32, #tpu.memory_space<vmem>>, vector<2x64xf32>
    tpu.vector_store %arg4[%c0_5, %c0_6], %5 {strides = array<i32>} : memref<2x64xf32, #tpu.memory_space<vmem>>, vector<2x64xf32>,
    return
  }
  func.func @transform_0(%arg0: i32) -> (i32, i32) {
    %c0_i32 = arith.constant 0 : i32
    %c0_i32_0 = arith.constant 0 : i32
    return %arg0, %c0_i32 : i32, i32
  }
  func.func @transform_1(%arg0: i32) -> (i32, i32) {
    %c0_i32 = arith.constant 0 : i32
    %c0_i32_0 = arith.constant 0 : i32
    %c0_i32_1 = arith.constant 0 : i32
    return %c0_i32, %c0_i32_0 : i32, i32
  }
  func.func @transform_2(%arg0: i32) -> (i32, i32) {
    %c0_i32 = arith.constant 0 : i32
    %c0_i32_0 = arith.constant 0 : i32
    %c0_i32_1 = arith.constant 0 : i32
    return %c0_i32, %c0_i32_0 : i32, i32
  }
  func.func @transform_3(%arg0: i32) -> (i32, i32) {
    %c0_i32 = arith.constant 0 : i32
    %c0_i32_0 = arith.constant 0 : i32
    return %arg0, %c0_i32 : i32, i32
  }
}

</mosaic_0001>

<bundles_post_ra>
// kernel: tpu_custom_call.1
= control target key start
LH: loop header
LB: loop body
LE: loop exit
PB: predicated region body
PF: predicated region fallthrough
CT: control target
= control target key end

     0   :  { %8 = vsyncpa [#allocation3], 0  ;;  %s343_s0 = inlined_call_operand.hbm [shape: f32[2,49], index: 0, kind: input, shape index: {}]   ;;  %s344_s1 = inlined_call_operand.hbm [shape: f32[49,64], index: 1, kind: input, shape index: {}]   ;;  %s345_s2 = inlined_call_operand.vmem [shape: f32[1,64], index: 2, kind: input, shape index: {}]   ;;  %s346_s3 = inlined_call_operand.hbm [shape: f32[2,64], index: 3, kind: output, shape index: {}]  }
   0x1   :  { %9 = vsyncpa [#allocation6], 0 }
   0x2   :  { %10 = vsyncpa [#allocation4], 0  ;;  %s269_s12 = smov [#allocation2]   ;;  %s270_s14 = smov [#allocation5]  }
   0x3   :  { %s17_s13 = sshll.u32 %s269_s12, 4  ;;  %s26_s15 = sshll.u32 %s270_s14, 4  ;;  %s18_s13 = int_to_ptr.vmem [resolvable:$true] %s17_s13  ;;  %s297_s15 = int_to_ptr.vmem [resolvable:$true] %s26_s15 }
   0x4   :  { %s197_s18 = scalar_lea.hbm %s343_s0, 32 }
   0x5   :  { %p198_p0 = scmp.ne.s32.totalorder %s343_s0, %s197_s18  ;;  %p201_p1 = scmp.lt.u32.totalorder %s197_s18, %s343_s0 }
   0x7   :  { %p203_p2 = pnand %p201_p1, %p198_p0 }
   0x9   :  { %206 = shalt.err (!%p203_p2)
}
   0xa   :  { %s207_s23 = scalar_lea.vmem %s18_s13, 32  ;;  %p212_p4 = scmp.lt.s32.totalorder %s18_s13, %s18_s13 }
   0xb   :  { %p208_p3 = scmp.ne.s32.totalorder %s18_s13, %s207_s23  ;;  %p213_p5 = scmp.lt.s32.totalorder %s207_s23, %s207_s23 }
   0xd   :  { %p214_p6 = por %p213_p5, %p212_p4 }
   0xf   :  { %p215_p7 = pnand %p214_p6, %p208_p3 }
  0x11   :  { %218 = shalt.err (!%p215_p7)
}
  0x12   :  { %20 = dma.hbm_to_vmem [thread:$0]  %s343_s0, 32, %s18_s13, [#allocation3]  }
  0x13   :  { %s219_s28 = scalar_lea.hbm %s344_s1, 896 }
  0x14   :  { %p220_p8 = scmp.ne.s32.totalorder %s344_s1, %s219_s28  ;;  %p223_p9 = scmp.lt.u32.totalorder %s219_s28, %s344_s1 }
  0x16   :  { %p225_p10 = pnand %p223_p9, %p220_p8 }
  0x18   :  { %228 = shalt.err (!%p225_p10)
}
  0x19   :  { %s229_s6 = scalar_lea.vmem %s297_s15, 896  ;;  %p234_p12 = scmp.lt.s32.totalorder %s297_s15, %s297_s15 }
  0x1a   :  { %p230_p11 = scmp.ne.s32.totalorder %s297_s15, %s229_s6  ;;  %p235_p13 = scmp.lt.s32.totalorder %s229_s6, %s229_s6 }
  0x1c   :  { %p236_p0 = por %p235_p13, %p234_p12 }
  0x1e   :  { %p237_p1 = pnand %p236_p0, %p230_p11 }
  0x20   :  { %240 = shalt.err (!%p237_p1)
}
  0x21   :  { %s271_s0 = smov 128   ;;  %s272_s7 = smov 8  }
  0x22   :  { %32 = dma.hbm_to_vmem [thread:$0]  %s344_s1, 896, %s297_s15, [#allocation6], %s271_s0, %s271_s0, %s272_s7  }
  0x23   :  { %263 = dma.done.wait [#allocation3], 32  }
  0x24   :  { %264 = vsyncadd [#allocation3], 4294967264 }
  0x25   :  { %265 = dma.done.wait [#allocation6], 896  }
  0x26   :  { %266 = vsyncadd [#allocation6], 4294966400  ;;  %v273_v0 = vmov 0.0|0.0   ;;  %vm274_vm0 = vmmov 0   ;;  %v275_v1 = vmov 0.0   ;;  %v42_v2 = vld [vmem:[#allocation5] sm:$0xff] }
  0x27   :  { %180 = vmatprep.subr.bf16.mxu0 %v273_v0  ;;  %177 = vmatprep.mubr.msk.f32.mxu0 %vm274_vm0, %v275_v1  ;;  %v43_v3 = vld [vmem:[#allocation5 + $0x8] sm:$0xff]  ;;  %v44_v4 = vld [vmem:[#allocation5 + $0x10] sm:$0xff]  ;;  %v45_v6 = vld [vmem:[#allocation5 + $0x18] sm:$0xff]  ;;  %vm60_vm1 = vcmask 1040384   ;;  %vm56_vm2 = vcmask 400384   ;;  %s276_s11 = smov [#allocation7]  }
  0x28   :  { %v181_v5 = vpack.c.bf16 %v43_v3, %v42_v2  ;;  %v184_v7 = vpack.c.bf16 %v45_v6, %v44_v4  ;;  %v46_v8 = vld [vmem:[#allocation5 + $0x20] sm:$0xff]  ;;  %v47_v9 = vld [vmem:[#allocation5 + $0x28] sm:$0xff]  ;;  %v48_v11 = vld [vmem:[#allocation5 + $0x30] sm:$0x1]  ;;  %s142_s12 = sshll.u32 %s276_s11, 4  ;;  %vm134_vm3 = vcmask 517120   ;;  %s143_s12 = int_to_ptr.vmem [resolvable:$true] %s142_s12 }
  0x29   :  { %v187_v10 = vpack.c.bf16 %v47_v9, %v46_v8  ;;  %v41_v12 = vld [vmem:[#allocation2] sm:$0x3]  ;;  %s241_s13 = scalar_lea.vmem %s143_s12, 32  ;;  %p246_p3 = scmp.lt.s32.totalorder %s143_s12, %s143_s12 }
  0x2a   :  { %182 = vmatpush3.bf16.msra.mxu0 %v181_v5  ;;  %v152_v13 = vld [vmem:[%s345_s2] ss:$0 sm:$0xff]  ;;  %p242_p2 = scmp.ne.s32.totalorder %s143_s12, %s241_s13  ;;  %p247_p4 = scmp.lt.s32.totalorder %s241_s13, %s241_s13 }
  0x2b   :  { %183 = vmatprep.subr.bf16.mxu0 %v273_v0 }
  0x2c   :  { %p248_p5 = por %p247_p4, %p246_p3 }
  0x2e   :  { %185 = vmatpush3.bf16.msra.mxu0 %v184_v7  ;;  %p249_p6 = pnand %p248_p5, %p242_p2 }
  0x2f   :  { %186 = vmatprep.subr.bf16.mxu0 %v273_v0 }
  0x32   :  { %188 = vmatpush3.bf16.msra.mxu0 %v187_v10 }
  0x33   :  { %175 = vmatprep.subr.mxu0 %v275_v1 }
  0x36   :  { %176 = vmatpush3.msk.msra.mxu0 %vm60_vm1, %v48_v11 }
  0x37   :  { %178 = vmatmul.mubr.msk.f32.vlgmr.msra.gmra.mrb[0].mxu0 %vm56_vm2, %v41_v12 }
 0x10a   :  { %v130_v14 = vpop.f32.mrb[0].mxu0 }
 0x10b   :  { %v131_v15 = vadd.f32 %v152_v13, %v130_v14  ;;  %v179_v16 = vpop.f32.mrb[1].mxu0 }
 0x10d   :  { %135 = vst.msk [vmem:[#allocation7] sm:$0x3] %vm134_vm3, %v131_v15 }
 0x10e   :  { %252 = shalt.err (!%p249_p6)
}
 0x10f   :  { %s253_s16 = scalar_lea.hbm %s346_s3, 32 }
 0x110   :  { %p254_p7 = scmp.ne.s32.totalorder %s346_s3, %s253_s16  ;;  %p257_p8 = scmp.lt.u32.totalorder %s253_s16, %s346_s3 }
 0x112   :  { %p259_p9 = pnand %p257_p8, %p254_p7 }
 0x114   :  { %262 = shalt.err (!%p259_p9)
}
 0x115   :  { %145 = dma.vmem_to_hbm [thread:$0]  %s143_s12, 32, %s346_s3, [#allocation4]  }
 0x116   :  { %267 = dma.done.wait [#allocation4], 32  }
 0x117   :  { %268 = vsyncadd [#allocation4], 4294967264 }
 0x118   :  { %149 = vsyncpa [#allocation3], 1 }
 0x119   :  { %150 = vsyncpa [#allocation6], 1 }
 0x11a   :  { %151 = vsyncpa [#allocation4], 1 }

</bundles_post_ra>
